<compile_context>
chip_gen: v5e
topology: v5e:2x2
jax: 0.10.0
libtpu: 0.0.40
codegen_flags: <defaults>
</compile_context>

<pallas_src>
import functools

import jax
import jax.numpy as jnp
from jax.experimental import pallas as pl
from jax.experimental.pallas import tpu as pltpu

LN_EPS = 1e-5  # PyTorch LayerNorm default


def _sublayer_wrapper_kernel(x_ref, gamma_ref, beta_ref, w_ref, bias_ref,
                             o_ref, h_ref):
    # x_ref:      (tm, D)  full-width row tile (LN stats + residual source)
    # gamma/beta: (1, D)   LayerNorm affine params
    # w_ref:      (D, tn)  Linear weight tile laid out for  h @ W  (= torch W.T)
    # bias_ref:   (1, tn)  Linear bias tile
    # o_ref:      (tm, tn) output tile
    # h_ref:      (tm, D)  VMEM scratch: LayerNorm(x)*gamma+beta, cast to the
    #                      weight dtype; persists across the j (column) steps.
    j = pl.program_id(1)
    tn = o_ref.shape[-1]

    # --- LayerNorm (f32, VPU), computed once per row tile (hoisted out of j) ---
    @pl.when(j == 0)
    def _():
        x = x_ref[...].astype(jnp.float32)
        mean = jnp.mean(x, axis=-1, keepdims=True)
        centered = x - mean
        var = jnp.mean(centered * centered, axis=-1, keepdims=True)  # biased
        xn = centered * jax.lax.rsqrt(var + LN_EPS)
        h = (xn * gamma_ref[...].astype(jnp.float32)
             + beta_ref[...].astype(jnp.float32))
        h_ref[...] = h.astype(h_ref.dtype)

    # --- sublayer: Linear on the MXU (weight-native dtype, f32 accumulation) ---
    y = jnp.dot(h_ref[...], w_ref[...], preferred_element_type=jnp.float32)
    y = y + bias_ref[...].astype(jnp.float32)

    # --- dropout (eval mode: identity) + residual add ---
    # Residual columns come from the resident full-width x block: no second HBM
    # read of the activations.  When the weight is N-tiled, the slice start is
    # a 128-aligned lane offset (tile-aligned -> no cross-lane work).
    if tn == x_ref.shape[-1]:
        xres = x_ref[...].astype(jnp.float32)
    else:
        col0 = pl.multiple_of(j * tn, 128)
        xres = x_ref[:, pl.ds(col0, tn)].astype(jnp.float32)
    o_ref[...] = (xres + y).astype(o_ref.dtype)


def _round_up(x, m):
    return (x + m - 1) // m * m


def _sublanes_for(dtype):
    # Sublane packing multiple: 8 for 32-bit, 16 for 16-bit, 32 for 8-bit.
    return {4: 8, 2: 16, 1: 32}.get(jnp.dtype(dtype).itemsize, 8)


def _vmem_budget_bytes():
    """Per-generation VMEM budget with headroom (~48 MiB v7x, ~96 MiB v5e/v6e)."""
    cap = 64 * 1024 * 1024  # conservative default = v7x physical per TensorCore
    try:
        info = pltpu.get_tpu_info()
        cap = int(getattr(info, "vmem_capacity_bytes", cap))
    except Exception:
        pass
    return min(cap * 3 // 4, 112 * 1024 * 1024)


def _vmem_usage_bytes(tm, tn, D, x_bytes, w_bytes, o_bytes):
    return (2 * tm * D * x_bytes      # x row tile (double-buffered)
            + 2 * D * tn * w_bytes    # weight column tile (double-buffered)
            + 2 * tm * tn * o_bytes   # output tile (double-buffered)
            + tm * D * w_bytes        # h scratch (single buffer)
            + 8 * D * 4)              # gamma / beta / bias (small)


def _pick_tiles(M, D, x_dtype, w_dtype, o_dtype, budget, block_rows, block_cols):
    sub = _sublanes_for(x_dtype)
    x_bytes = jnp.dtype(x_dtype).itemsize
    w_bytes = jnp.dtype(w_dtype).itemsize
    o_bytes = jnp.dtype(o_dtype).itemsize

    if block_rows is None:
        # Big tiles amortize per-grid-step overhead; v5e/v6e (96 MiB budget)
        # get 512 rows, v7x (48 MiB budget) starts at 256 and shrinks if needed.
        block_rows = 512 if budget >= 80 * 1024 * 1024 else 256
    tm = max(sub, min(_round_up(block_rows, sub), _round_up(M, sub)))

    # tn candidates: multiples of 128 dividing D, largest first.  tn == D keeps
    # the whole weight resident in VMEM, so W streams from HBM exactly once.
    cands = sorted((t for t in range(128, D + 1, 128) if D % t == 0),
                   reverse=True)
    if block_cols is not None:
        capped = [t for t in cands if t <= max(128, block_cols)]
        cands = capped or [cands[-1]]

    while True:
        fit = [t for t in cands
               if _vmem_usage_bytes(tm, t, D, x_bytes, w_bytes, o_bytes) <= budget]
        if fit:
            return tm, fit[0]
        if tm <= sub:
            return tm, cands[-1]   # smallest tiles; best effort
        tm = max(sub, _round_up(tm // 2, sub))


@functools.partial(jax.jit, static_argnames=("block_rows", "block_cols"))
def sublayer_wrapper(x, gamma, beta, w, bias, *, block_rows=None, block_cols=None):
    """x: [B, S, D]; returns x + Linear(LayerNorm(x)).  w is (D, D) = torch W.T."""
    B, S, D = x.shape
    assert D % 128 == 0, (
        "hidden size must be a multiple of 128 for lane-dense TPU tiles "
        "(pad the model dimension).")
    M = B * S

    budget = _vmem_budget_bytes()
    tm, tn = _pick_tiles(M, D, x.dtype, w.dtype, x.dtype, budget,
                         block_rows, block_cols)

    x2 = x.reshape(M, D)
    gamma2 = gamma.reshape(1, D)
    beta2 = beta.reshape(1, D)
    bias2 = bias.reshape(1, D)

    grid = (pl.cdiv(M, tm), D // tn)

    cost = pl.CostEstimate(
        flops=2 * M * D * D,
        transcendentals=M,  # one rsqrt per row
        bytes_accessed=(M * D * x.dtype.itemsize       # x read once
                        + D * D * w.dtype.itemsize     # W read once (tn == D)
                        + M * D * x.dtype.itemsize),   # output write
    )

    out = pl.pallas_call(
        _sublayer_wrapper_kernel,
        out_shape=jax.ShapeDtypeStruct((M, D), x.dtype),
        grid_spec=pltpu.PrefetchScalarGridSpec(
            num_scalar_prefetch=0,
            grid=grid,
            in_specs=[
                pl.BlockSpec((tm, D), lambda i, j: (i, 0)),   # x (full width)
                pl.BlockSpec((1, D), lambda i, j: (0, 0)),    # gamma
                pl.BlockSpec((1, D), lambda i, j: (0, 0)),    # beta
                pl.BlockSpec((D, tn), lambda i, j: (0, j)),   # W column tile
                pl.BlockSpec((1, tn), lambda i, j: (0, j)),   # bias tile
            ],
            out_specs=pl.BlockSpec((tm, tn), lambda i, j: (i, j)),
            scratch_shapes=[pltpu.VMEM((tm, D), w.dtype)],    # h = LN(x)*g + b
        ),
        compiler_params=pltpu.CompilerParams(
            dimension_semantics=("parallel", "arbitrary"),
            vmem_limit_bytes=budget,
        ),
        cost_estimate=cost,
    )(x2, gamma2, beta2, w, bias2)

    return out.reshape(B, S, D)


def _reference(x, gamma, beta, w, bias):
    """Pure-JAX reference matching the kernel's precision path."""
    xf = x.astype(jnp.float32)
    mean = jnp.mean(xf, axis=-1, keepdims=True)
    var = jnp.mean((xf - mean) ** 2, axis=-1, keepdims=True)
    xn = (xf - mean) * jax.lax.rsqrt(var + LN_EPS)
    h = xn * gamma.astype(jnp.float32) + beta.astype(jnp.float32)
    y = jnp.dot(h.astype(w.dtype), w,
                preferred_element_type=jnp.float32) + bias.astype(jnp.float32)
    return (xf + y).astype(x.dtype)


if __name__ == "__main__":
    # --- Test 1: f32 end-to-end (matches the PyTorch module numerics) --------
    B, S, D = 2, 8, 128  # batch=2, seq=8, hidden(size)=128 (lane-dense)
    kx, kw, kb = jax.random.split(jax.random.PRNGKey(0), 3)

    x = jax.random.normal(kx, (B, S, D), dtype=jnp.float32)
    gamma = jnp.ones((D,), dtype=jnp.float32)   # PyTorch LayerNorm default init
    beta = jnp.zeros((D,), dtype=jnp.float32)
    w = jax.random.normal(kw, (D, D), dtype=jnp.float32) / jnp.sqrt(D)
    bias = jax.random.normal(kb, (D,), dtype=jnp.float32) * 0.01

    out = jax.block_until_ready(sublayer_wrapper(x, gamma, beta, w, bias))
    ref = _reference(x, gamma, beta, w, bias)
    assert out.shape == (B, S, D)
    assert jnp.allclose(out, ref, atol=1e-4, rtol=1e-4), "f32 mismatch vs reference"

    # --- Test 2: bf16 weights/activations (bf16 MXU path), ragged row count ---
    B2, S2, D2 = 2, 7, 256  # M = 14: exercises the masked partial row block
    kx2, kw2, kb2 = jax.random.split(jax.random.PRNGKey(1), 3)

    x_b = jax.random.normal(kx2, (B2, S2, D2), dtype=jnp.float32).astype(jnp.bfloat16)
    gamma_b = jnp.ones((D2,), dtype=jnp.bfloat16)
    beta_b = jnp.zeros((D2,), dtype=jnp.bfloat16)
    w_b = (jax.random.normal(kw2, (D2, D2), dtype=jnp.float32)
           / jnp.sqrt(D2)).astype(jnp.bfloat16)
    bias_b = (jax.random.normal(kb2, (D2,), dtype=jnp.float32) * 0.01
              ).astype(jnp.bfloat16)

    out_b = jax.block_until_ready(sublayer_wrapper(x_b, gamma_b, beta_b, w_b, bias_b))
    ref_b = _reference(x_b, gamma_b, beta_b, w_b, bias_b)
    assert out_b.shape == (B2, S2, D2)
    assert jnp.allclose(out_b.astype(jnp.float32), ref_b.astype(jnp.float32),
                        atol=2e-2, rtol=2e-2), "bf16 mismatch vs reference"

    print("KERNEL_OK")
</pallas_src>

<mosaic_0001>
module attributes {stable_mosaic.version = 11 : i64} {
  func.func @_sublayer_wrapper_kernel(%arg0: i32, %arg1: i32, %arg2: memref<16x128xf32, #tpu.memory_space<vmem>>, %arg3: memref<1x128xf32, #tpu.memory_space<vmem>>, %arg4: memref<1x128xf32, #tpu.memory_space<vmem>>, %arg5: memref<128x128xf32, #tpu.memory_space<vmem>>, %arg6: memref<1x128xf32, #tpu.memory_space<vmem>>, %arg7: memref<16x128xf32, #tpu.memory_space<vmem>>, %arg8: memref<16x128xf32, #tpu.memory_space<vmem>>) attributes {dimension_semantics = [#tpu.dimension_semantics<parallel>, #tpu.dimension_semantics<arbitrary>], iteration_bounds = array<i64: 1, 1>, scalar_prefetch = 0 : i64, scratch_operands = 1 : i64, tpu.core_type = #tpu.core_type<tc>, window_params = [{transform_indices = @transform_0, window_bounds = array<i64: 16, 128>}, {pipeline_mode = #tpu.pipeline_mode<synchronous>, transform_indices = @transform_1, window_bounds = array<i64: 1, 128>}, {pipeline_mode = #tpu.pipeline_mode<synchronous>, transform_indices = @transform_2, window_bounds = array<i64: 1, 128>}, {transform_indices = @transform_3, window_bounds = array<i64: 128, 128>}, {transform_indices = @transform_4, window_bounds = array<i64: 1, 128>}, {transform_indices = @transform_5, window_bounds = array<i64: 16, 128>}]} {
    %c0_i32 = arith.constant 0 : i32
    %0 = arith.cmpi eq, %arg1, %c0_i32 : i32
    %1 = arith.extui %0 : i1 to i32
    %c0_i32_0 = arith.constant 0 : i32
    %2 = arith.cmpi ne, %1, %c0_i32_0 : i32
    scf.if %2 {
      %c0_10 = arith.constant 0 : index
      %c0_11 = arith.constant 0 : index
      %12 = vector.load %arg2[%c0_10, %c0_11] : memref<16x128xf32, #tpu.memory_space<vmem>>, vector<16x128xf32>
      %cst_12 = arith.constant dense<0.000000e+00> : vector<16xf32>
      %13 = vector.multi_reduction <add>, %12, %cst_12 [1] : vector<16x128xf32> to vector<16xf32>
      %14 = vector.shape_cast %13 : vector<16xf32> to vector<16x1xf32>
      %cst_13 = arith.constant 1.280000e+02 : f32
      %15 = vector.broadcast %cst_13 : f32 to vector<16x1xf32>
      %16 = arith.divf %14, %15 : vector<16x1xf32>
      %17 = vector.broadcast %16 : vector<16x1xf32> to vector<16x128xf32>
      %18 = arith.subf %12, %17 : vector<16x128xf32>
      %19 = arith.mulf %18, %18 : vector<16x128xf32>
      %cst_14 = arith.constant dense<0.000000e+00> : vector<16xf32>
      %20 = vector.multi_reduction <add>, %19, %cst_14 [1] : vector<16x128xf32> to vector<16xf32>
      %21 = vector.shape_cast %20 : vector<16xf32> to vector<16x1xf32>
      %cst_15 = arith.constant 1.280000e+02 : f32
      %22 = vector.broadcast %cst_15 : f32 to vector<16x1xf32>
      %23 = arith.divf %21, %22 : vector<16x1xf32>
      %cst_16 = arith.constant 9.99999974E-6 : f32
      %24 = vector.broadcast %cst_16 : f32 to vector<16x1xf32>
      %25 = arith.addf %23, %24 : vector<16x1xf32>
      %26 = math.rsqrt %25 : vector<16x1xf32>
      %27 = vector.broadcast %26 : vector<16x1xf32> to vector<16x128xf32>
      %28 = arith.mulf %18, %27 : vector<16x128xf32>
      %c0_17 = arith.constant 0 : index
      %c0_18 = arith.constant 0 : index
      %29 = vector.load %arg3[%c0_17, %c0_18] : memref<1x128xf32, #tpu.memory_space<vmem>>, vector<1x128xf32>
      %30 = vector.broadcast %29 : vector<1x128xf32> to vector<16x128xf32>
      %31 = arith.mulf %28, %30 : vector<16x128xf32>
      %c0_19 = arith.constant 0 : index
      %c0_20 = arith.constant 0 : index
      %32 = vector.load %arg4[%c0_19, %c0_20] : memref<1x128xf32, #tpu.memory_space<vmem>>, vector<1x128xf32>
      %33 = vector.broadcast %32 : vector<1x128xf32> to vector<16x128xf32>
      %34 = arith.addf %31, %33 : vector<16x128xf32>
      %c0_21 = arith.constant 0 : index
      %c0_22 = arith.constant 0 : index
      %35 = vector.load %arg8[%c0_21, %c0_22] : memref<16x128xf32, #tpu.memory_space<vmem>>, vector<16x128xf32>
      tpu.vector_store %arg8[%c0_21, %c0_22], %34 {strides = array<i32>} : memref<16x128xf32, #tpu.memory_space<vmem>>, vector<16x128xf32>,
    } else {
    }
    %c0 = arith.constant 0 : index
    %c0_1 = arith.constant 0 : index
    %3 = vector.load %arg8[%c0, %c0_1] : memref<16x128xf32, #tpu.memory_space<vmem>>, vector<16x128xf32>
    %c0_2 = arith.constant 0 : index
    %c0_3 = arith.constant 0 : index
    %4 = vector.load %arg5[%c0_2, %c0_3] : memref<128x128xf32, #tpu.memory_space<vmem>>, vector<128x128xf32>
    %cst = arith.constant dense<0.000000e+00> : vector<16x128xf32>
    %5 = tpu.matmul %3, %4, %cst {dimension_numbers = #tpu.dot_dimension_numbers<[1], [0], [0], [1], [0, 0, 1, 1], [], []>} : vector<16x128xf32>, vector<128x128xf32>, vector<16x128xf32> -> vector<16x128xf32>
    %c0_4 = arith.constant 0 : index
    %c0_5 = arith.constant 0 : index
    %6 = vector.load %arg6[%c0_4, %c0_5] : memref<1x128xf32, #tpu.memory_space<vmem>>, vector<1x128xf32>
    %7 = vector.broadcast %6 : vector<1x128xf32> to vector<16x128xf32>
    %8 = arith.addf %5, %7 : vector<16x128xf32>
    %c0_6 = arith.constant 0 : index
    %c0_7 = arith.constant 0 : index
    %9 = vector.load %arg2[%c0_6, %c0_7] : memref<16x128xf32, #tpu.memory_space<vmem>>, vector<16x128xf32>
    %10 = arith.addf %9, %8 : vector<16x128xf32>
    %c0_8 = arith.constant 0 : index
    %c0_9 = arith.constant 0 : index
    %11 = vector.load %arg7[%c0_8, %c0_9] : memref<16x128xf32, #tpu.memory_space<vmem>>, vector<16x128xf32>
    tpu.vector_store %arg7[%c0_8, %c0_9], %10 {strides = array<i32>} : memref<16x128xf32, #tpu.memory_space<vmem>>, vector<16x128xf32>,
    return
  }
  func.func @transform_0(%arg0: i32, %arg1: i32) -> (i32, i32) {
    %c0_i32 = arith.constant 0 : i32
    %c0_i32_0 = arith.constant 0 : i32
    return %arg0, %c0_i32 : i32, i32
  }
  func.func @transform_1(%arg0: i32, %arg1: i32) -> (i32, i32) {
    %c0_i32 = arith.constant 0 : i32
    %c0_i32_0 = arith.constant 0 : i32
    %c0_i32_1 = arith.constant 0 : i32
    return %c0_i32, %c0_i32_0 : i32, i32
  }
  func.func @transform_2(%arg0: i32, %arg1: i32) -> (i32, i32) {
    %c0_i32 = arith.constant 0 : i32
    %c0_i32_0 = arith.constant 0 : i32
    %c0_i32_1 = arith.constant 0 : i32
    return %c0_i32, %c0_i32_0 : i32, i32
  }
  func.func @transform_3(%arg0: i32, %arg1: i32) -> (i32, i32) {
    %c0_i32 = arith.constant 0 : i32
    %c0_i32_0 = arith.constant 0 : i32
    return %c0_i32, %arg1 : i32, i32
  }
  func.func @transform_4(%arg0: i32, %arg1: i32) -> (i32, i32) {
    %c0_i32 = arith.constant 0 : i32
    %c0_i32_0 = arith.constant 0 : i32
    return %c0_i32, %arg1 : i32, i32
  }
  func.func @transform_5(%arg0: i32, %arg1: i32) -> (i32, i32) {
    %c0_i32 = arith.constant 0 : i32
    return %arg0, %arg1 : i32, i32
  }
}

</mosaic_0001>

<bundles_post_ra>
// kernel: sublayer_wrapper.1
= control target key start
LH: loop header
LB: loop body
LE: loop exit
PB: predicated region body
PF: predicated region fallthrough
CT: control target
= control target key end

     0   :  { %10 = vsyncpa [#allocation4], 0  ;;  %s383_s0 = inlined_call_operand.hbm [shape: f32[16,128], index: 0, kind: input, shape index: {}]   ;;  %s384_s1 = inlined_call_operand.vmem [shape: f32[1,128], index: 1, kind: input, shape index: {}]   ;;  %s385_s2 = inlined_call_operand.vmem [shape: f32[1,128], index: 2, kind: input, shape index: {}]   ;;  %s386_s3 = inlined_call_operand.hbm [shape: f32[128,128], index: 3, kind: input, shape index: {}]   ;;  %s387_s4 = inlined_call_operand.vmem [shape: f32[1,128], index: 4, kind: input, shape index: {}]   ;;  %s388_s5 = inlined_call_operand.hbm [shape: f32[16,128], index: 5, kind: output, shape index: {}]  }
   0x1   :  { %11 = vsyncpa [#allocation7], 0 }
   0x2   :  { %12 = vsyncpa [#allocation5], 0  ;;  %s17_s20 = sshll.u32 %s383_s0, 4  ;;  %s300_s21 = smov [#allocation3]   ;;  %s18_s20 = int_to_ptr.hbm [resolvable:$true] %s17_s20 }
   0x3   :  { %s19_s22 = sshll.u32 %s300_s21, 4  ;;  %s34_s25 = sshll.u32 %s386_s3, 4  ;;  %s20_s22 = int_to_ptr.vmem [resolvable:$true] %s19_s22  ;;  %s35_s25 = int_to_ptr.hbm [resolvable:$true] %s34_s25 }
   0x4   :  { %s301_s26 = smov 128   ;;  %s302_s27 = smov 8  }
   0x5   :  { %25 = dma.hbm_to_vmem [thread:$0]  %s18_s20, 256, %s20_s22, [#allocation4], %s301_s26, %s301_s26, %s302_s27  }
   0x6   :  { %s303_s28 = smov [#allocation6]  }
   0x7   :  { %s36_s29 = sshll.u32 %s303_s28, 4  ;;  %s37_s29 = int_to_ptr.vmem [resolvable:$true] %s36_s29 }
   0x8   :  { %42 = dma.hbm_to_vmem [thread:$0]  %s35_s25, 2048, %s37_s29, [#allocation7], %s301_s26, %s301_s26, %s302_s27  }
   0x9   :  { %294 = dma.done.wait [#allocation4], 256  }
   0xa   :  { %295 = vsyncadd [#allocation4], 4294967040 }
   0xb   :  { %296 = dma.done.wait [#allocation7], 2048  }
   0xc   :  { %297 = vsyncadd [#allocation7], 4294965248  ;;  %v348_v0 = vld [vmem:[#allocation3] sm:$0xff]  ;;  %v351_v1 = vld [vmem:[#allocation3 + $0x8] sm:$0xff]  ;;  %v304_v2 = vmov 128.0   ;;  %s177_s11 = sshll.u32 %s388_s5, 4  ;;  %s178_s11 = int_to_ptr.hbm [resolvable:$true] %s177_s11 }
   0xd   :  { %59 = vadd.xlane.f32.xlu0 %v348_v0  ;;  %216 = vrcp.f32 %v304_v2  ;;  %v137_v5 = vld [vmem:[#allocation6 + $0x78] sm:$0xff]  ;;  %v136_v6 = vld [vmem:[#allocation6 + $0x70] sm:$0xff]  ;;  %v135_v19 = vld [vmem:[#allocation6 + $0x68] sm:$0xff] }
   0xe   :  { %142 = vmatpush.msra.mxu0 %v137_v5  ;;  %191 = vmatpush.msra.mxu1 %v137_v5  ;;  %v134_v20 = vld [vmem:[#allocation6 + $0x60] sm:$0xff]  ;;  %v133_v21 = vld [vmem:[#allocation6 + $0x58] sm:$0xff]  ;;  %v132_v22 = vld [vmem:[#allocation6 + $0x50] sm:$0xff] }
   0xf   :  { %v131_v23 = vld [vmem:[#allocation6 + $0x48] sm:$0xff]  ;;  %v130_v24 = vld [vmem:[#allocation6 + $0x40] sm:$0xff]  ;;  %v129_v25 = vld [vmem:[#allocation6 + $0x38] sm:$0xff] }
  0x10   :  { %143 = vmatpush.msra.mxu0 %v136_v6  ;;  %192 = vmatpush.msra.mxu1 %v136_v6  ;;  %v128_v26 = vld [vmem:[#allocation6 + $0x30] sm:$0xff]  ;;  %v127_v27 = vld [vmem:[#allocation6 + $0x28] sm:$0xff]  ;;  %v126_v28 = vld [vmem:[#allocation6 + $0x20] sm:$0xff] }
  0x11   :  { %v125_v29 = vld [vmem:[#allocation6 + $0x18] sm:$0xff]  ;;  %v124_v30 = vld [vmem:[#allocation6 + $0x10] sm:$0xff]  ;;  %v123_v31 = vld [vmem:[#allocation6 + $0x8] sm:$0xff] }
  0x12   :  { %144 = vmatpush.msra.mxu0 %v135_v19  ;;  %193 = vmatpush.msra.mxu1 %v135_v19  ;;  %v122_v32 = vld [vmem:[#allocation6] sm:$0xff]  ;;  %v213_v47 = vld [vmem:[%s384_s1] ss:$0 sm:$0xff] }
  0x13   :  { %v217_v3 = vpop.eup %216  ;;  %v214_v51 = vld [vmem:[%s385_s2] ss:$0 sm:$0xff]  ;;  %s305_s2 = smov [#allocation8]  }
  0x14   :  { %v64_v4 = vmul.f32 128.0, %v217_v3  ;;  %vm68_vm0 = vweird.f32 %v217_v3  ;;  %145 = vmatpush.msra.mxu0 %v134_v20  ;;  %194 = vmatpush.msra.mxu1 %v134_v20  ;;  %v215_v61 = vld [vmem:[%s387_s4] ss:$0 sm:$0xff]  ;;  %s175_s8 = sshll.u32 %s305_s2, 4  ;;  %s176_s8 = int_to_ptr.vmem [resolvable:$true] %s175_s8 }
  0x15   :  { %61 = vadd.xlane.f32.xlu0 %v351_v1 }
  0x16   :  { %v65_v7 = vsub.f32 1.0, %v64_v4  ;;  %146 = vmatpush.msra.mxu0 %v133_v21  ;;  %195 = vmatpush.msra.mxu1 %v133_v21 }
  0x18   :  { %v66_v8 = vmul.f32 %v217_v3, %v65_v7  ;;  %147 = vmatpush.msra.mxu0 %v132_v22  ;;  %196 = vmatpush.msra.mxu1 %v132_v22 }
  0x1a   :  { %v67_v9 = vadd.f32 %v217_v3, %v66_v8  ;;  %148 = vmatpush.msra.mxu0 %v131_v23  ;;  %197 = vmatpush.msra.mxu1 %v131_v23 }
  0x1c   :  { %v69_v10 = vsel %vm68_vm0, %v217_v3, %v67_v9  ;;  %149 = vmatpush.msra.mxu0 %v130_v24  ;;  %198 = vmatpush.msra.mxu1 %v130_v24 }
  0x1e   :  { %150 = vmatpush.msra.mxu0 %v129_v25  ;;  %199 = vmatpush.msra.mxu1 %v129_v25 }
  0x20   :  { %151 = vmatpush.msra.mxu0 %v128_v26  ;;  %200 = vmatpush.msra.mxu1 %v128_v26 }
  0x22   :  { %152 = vmatpush.msra.mxu0 %v127_v27  ;;  %201 = vmatpush.msra.mxu1 %v127_v27 }
  0x24   :  { %153 = vmatpush.msra.mxu0 %v126_v28  ;;  %202 = vmatpush.msra.mxu1 %v126_v28 }
  0x26   :  { %154 = vmatpush.msra.mxu0 %v125_v29  ;;  %203 = vmatpush.msra.mxu1 %v125_v29 }
  0x28   :  { %155 = vmatpush.msra.mxu0 %v124_v30  ;;  %204 = vmatpush.msra.mxu1 %v124_v30 }
  0x2a   :  { %156 = vmatpush.msra.mxu0 %v123_v31  ;;  %205 = vmatpush.msra.mxu1 %v123_v31 }
  0x2c   :  { %157 = vmatpush.msra.mxu0 %v122_v32  ;;  %206 = vmatpush.msra.mxu1 %v122_v32 }
  0x80   :  { %v60_v11 = vpop.xlane.xlu0 %59 }
  0x81   :  { %v70_v12 = vmul.f32 %v69_v10, %v60_v11 }
  0x83   :  { %v355_v13 = vsub.f32 %v348_v0, %v70_v12 }
  0x85   :  { %v74_v14 = vmul.f32 %v355_v13, %v355_v13 }
  0x87   :  { %76 = vadd.xlane.f32.xlu1 %v74_v14 }
  0x88   :  { %v62_v15 = vpop.xlane.xlu0 %61 }
  0x89   :  { %v71_v16 = vmul.f32 %v69_v10, %v62_v15 }
  0x8b   :  { %v360_v17 = vsub.f32 %v351_v1, %v71_v16 }
  0x8d   :  { %v75_v18 = vmul.f32 %v360_v17, %v360_v17 }
  0x8f   :  { %78 = vadd.xlane.f32.xlu1 %v75_v18 }
  0xfa   :  { %v77_v33 = vpop.xlane.xlu1 %76 }
  0xfb   :  { %v80_v34 = vmul.f32 %v77_v33, %v69_v10 }
  0xfd   :  { %v82_v35 = vadd.f32 1e-05, %v80_v34 }
  0xff   :  { %218 = vrsqrt.f32 %v82_v35  ;;  %vm90_vm2 = vweird.f32 %v82_v35 }
 0x102   :  { %v79_v36 = vpop.xlane.xlu1 %78 }
 0x103   :  { %v81_v37 = vmul.f32 %v79_v36, %v69_v10 }
 0x105   :  { %v219_v38 = vpop.eup %218  ;;  %v83_v39 = vadd.f32 1e-05, %v81_v37 }
 0x106   :  { %v85_v40 = vmul.f32 %v219_v38, %v82_v35  ;;  %vm91_vm1 = vweird.f32 %v219_v38 }
 0x107   :  { %220 = vrsqrt.f32 %v83_v39  ;;  %vm92_vm3 = vmor %vm90_vm2, %vm91_vm1  ;;  %vm100_vm5 = vweird.f32 %v83_v39 }
 0x108   :  { %v86_v41 = vmul.f32 %v219_v38, %v85_v40 }
 0x10a   :  { %v87_v42 = vmul.f32 0.5, %v86_v41 }
 0x10c   :  { %v88_v43 = vsub.f32 1.5, %v87_v42 }
 0x10d   :  { %v221_v44 = vpop.eup %220 }
 0x10e   :  { %v89_v45 = vmul.f32 %v219_v38, %v88_v43  ;;  %v95_v46 = vmul.f32 %v221_v44, %v83_v39  ;;  %vm101_vm4 = vweird.f32 %v221_v44 }
 0x10f   :  { %vm102_vm6 = vmor %vm100_vm5, %vm101_vm4 }
 0x110   :  { %v96_v48 = vmul.f32 %v221_v44, %v95_v46  ;;  %v93_v49 = vsel %vm92_vm3, %v219_v38, %v89_v45 }
 0x111   :  { %v104_v50 = vmul.f32 %v93_v49, %v355_v13 }
 0x112   :  { %v97_v52 = vmul.f32 0.5, %v96_v48 }
 0x113   :  { %v110_v53 = vmul.f32 %v213_v47, %v104_v50 }
 0x114   :  { %v98_v54 = vsub.f32 1.5, %v97_v52 }
 0x115   :  { %v116_v55 = vadd.f32 %v214_v51, %v110_v53 }
 0x116   :  { %v99_v56 = vmul.f32 %v221_v44, %v98_v54 }
 0x117   :  { %158 = vmatmul.f32.vlgmr.msra.gmra.mxu0 %v116_v55 }
 0x118   :  { %v103_v57 = vsel %vm102_vm6, %v221_v44, %v99_v56 }
 0x119   :  { %v105_v58 = vmul.f32 %v103_v57, %v360_v17 }
 0x11b   :  { %v111_v59 = vmul.f32 %v213_v47, %v105_v58 }
 0x11d   :  { %v117_v60 = vadd.f32 %v214_v51, %v111_v59 }
 0x11f   :  { %161 = vmatmul.f32.vlgmr.msra.gmra.mxu1 %v117_v60 }
 0x194   :  { %v159_v62 = vpop.f32.mrf.mxu0 }
 0x195   :  { %v160_v63 = vadd.f32 %v215_v61, %v159_v62 }
 0x197   :  { %v167_v2 = vadd.f32 %v160_v63, %v348_v0 }
 0x199   :  { %169 = vst [vmem:[#allocation8] sm:$0xff] %v167_v2 }
 0x19c   :  { %v162_v3 = vpop.f32.mrf.mxu1 }
 0x19d   :  { %v163_v4 = vadd.f32 %v215_v61, %v162_v3 }
 0x19f   :  { %v168_v5 = vadd.f32 %v163_v4, %v351_v1 }
 0x1a1   :  { %170 = vst [vmem:[#allocation8 + $0x8] sm:$0xff] %v168_v5 }
 0x1a2   :  { %183 = dma.vmem_to_hbm [thread:$0]  %s176_s8, 256, %s178_s11, [#allocation5], %s301_s26, %s301_s26, %s302_s27  }
 0x1a3   :  { %298 = dma.done.wait [#allocation5], 256  }
 0x1a4   :  { %299 = vsyncadd [#allocation5], 4294967040 }
 0x1a5   :  { %188 = vsyncpa [#allocation4], 1 }
 0x1a6   :  { %189 = vsyncpa [#allocation7], 1 }
 0x1a7   :  { %190 = vsyncpa [#allocation5], 1 }

</bundles_post_ra>
